<compile_context>
chip_gen: v6e
topology: v6e:2x2x1
jax: 0.10.0
libtpu: 0.0.40
codegen_flags: <defaults>
</compile_context>

<pallas_src>
import jax
import jax.numpy as jnp
from jax import lax
from jax.experimental import pallas as pl
from jax.experimental.pallas import tpu as pltpu  # noqa: F401  (kept for future batched/prng variants)

LANES = 128  # full vreg lane width; also the padded width of H and A+1


def _round_up(n, m):
    return (n + m - 1) // m * m


def _forward_block(x, pk_ref, num_actions, s_pad, r_b1, r_wh, r_bh):
    """x: (B_pad, s_pad) f32 activations.

    Returns a (B_pad, 128) slab: softmax probs in cols [0, A), raw state value in
    col A, zeros in cols > A.  All loads/stores are full-lane (128) and 8-row
    aligned; both matmuls hit the MXU with aligned tiles.
    """
    w1 = pk_ref[0:s_pad, :]               # (s_pad, 128)  W1 zero-padded beyond H
    b1 = pk_ref[r_b1:r_b1 + 1, :]         # (1, 128)
    wh = pk_ref[r_wh:r_wh + LANES, :]     # (128, 128)    [W_action | W_value | 0]
    bh = pk_ref[r_bh:r_bh + 1, :]         # (1, 128)

    # hidden: cols >= H are relu(0 + 0) = 0, so the full-width second matmul is exact
    h = jnp.maximum(jnp.dot(x, w1, preferred_element_type=jnp.float32) + b1, 0.0)
    z = jnp.dot(h, wh, preferred_element_type=jnp.float32) + bh        # (B_pad, 128)

    col = lax.broadcasted_iota(jnp.int32, z.shape, 1)
    is_prob = col < num_actions
    scores = jnp.where(is_prob, z, -jnp.inf)          # mask value + padding columns
    m = jnp.max(scores, axis=-1, keepdims=True)       # stable softmax
    e = jnp.where(is_prob, jnp.exp(scores - m), 0.0)
    denom = jnp.sum(e, axis=-1, keepdims=True)
    probs = e / denom                                  # exact: probs sum to 1
    return jnp.where(is_prob, probs, z)                # col A carries the raw value


def _full_spec(shape):
    return pl.BlockSpec(shape, lambda: (0,) * len(shape))


# ---------------------------------------------------------------------------
# Dense path: general forward(x), x of shape (B, state_dim)
# ---------------------------------------------------------------------------
def ac_model_forward(x, params):
    B, S = x.shape
    A = params["num_actions"]
    s_pad, r_b1, r_wh, r_bh = params["s_pad"], params["r_b1"], params["r_wh"], params["r_bh"]
    packed = params["packed"]

    b_pad = _round_up(B, 8)
    x_pad = jnp.zeros((b_pad, s_pad), jnp.float32).at[:B, :S].set(x.astype(jnp.float32))

    def kernel(x_ref, pk_ref, out_ref):
        out_ref[...] = _forward_block(x_ref[...], pk_ref, A, s_pad, r_b1, r_wh, r_bh)

    out = pl.pallas_call(
        kernel,
        out_shape=jax.ShapeDtypeStruct((b_pad, LANES), jnp.float32),
        in_specs=[_full_spec(x_pad.shape), _full_spec(packed.shape)],
        out_specs=_full_spec((b_pad, LANES)),
    )(x_pad, packed)
    return out[:B, :A], out[:B, A:A + 1]               # probs (B, A), values (B, 1)


# ---------------------------------------------------------------------------
# One-hot fast path: forward(one_hot(state_ids)) with the one-hot matrix built
# in-kernel (iota == ids) -- what select_action actually feeds forward.
# ---------------------------------------------------------------------------
def ac_model_forward_onehot(state_ids, params):
    B = state_ids.shape[0]
    A = params["num_actions"]
    s_pad, r_b1, r_wh, r_bh = params["s_pad"], params["r_b1"], params["r_wh"], params["r_bh"]
    packed = params["packed"]

    b_pad = _round_up(B, 8)
    ids = jnp.full((b_pad, 1), -1, jnp.int32).at[:B, 0].set(state_ids.astype(jnp.int32))

    def kernel(ids_ref, pk_ref, out_ref):
        cols = lax.broadcasted_iota(jnp.int32, (b_pad, s_pad), 1)
        x = (cols == ids_ref[...]).astype(jnp.float32)   # one-hot on the VPU, no gather
        out_ref[...] = _forward_block(x, pk_ref, A, s_pad, r_b1, r_wh, r_bh)

    out = pl.pallas_call(
        kernel,
        out_shape=jax.ShapeDtypeStruct((b_pad, LANES), jnp.float32),
        in_specs=[_full_spec(ids.shape), _full_spec(packed.shape)],
        out_specs=_full_spec((b_pad, LANES)),
    )(ids, packed)
    return out[:B, :A], out[:B, A:A + 1]               # probs (B, A), values (B, 1)


# ---------------------------------------------------------------------------
# Parameter init (mimics PyTorch nn.Linear U(-1/sqrt(fan_in), +1/sqrt(fan_in)))
# and packing into ONE lane-dense (rows, 128) buffer with 8-row-aligned sections.
# ---------------------------------------------------------------------------
def init_params(key, state_dim, hidden_units, num_actions):
    assert hidden_units <= LANES and num_actions + 1 <= LANES
    ks = jax.random.split(key, 6)

    def lin(kw, kb, fan_in, fan_out):
        bound = 1.0 / jnp.sqrt(jnp.asarray(fan_in, jnp.float32))
        w = jax.random.uniform(kw, (fan_in, fan_out), jnp.float32, -bound, bound)
        b = jax.random.uniform(kb, (1, fan_out), jnp.float32, -bound, bound)
        return w, b

    w1, b1 = lin(ks[0], ks[1], state_dim, hidden_units)     # hidden
    w2, b2 = lin(ks[2], ks[3], hidden_units, num_actions)   # action_head
    w3, b3 = lin(ks[4], ks[5], hidden_units, 1)             # value_head

    s_pad = _round_up(state_dim, 8)
    r_b1 = s_pad
    r_wh = r_b1 + 8
    r_bh = r_wh + LANES

    w_heads = jnp.concatenate([w2, w3], axis=1)              # (H, A+1)
    b_heads = jnp.concatenate([b2, b3], axis=1)              # (1, A+1)

    def pad(m, rows):
        return jnp.pad(m, ((0, rows - m.shape[0]), (0, LANES - m.shape[1])))

    packed = jnp.concatenate([
        pad(w1, s_pad),        # rows [0, s_pad)            W1      -> (s_pad, 128)
        pad(b1, 8),            # rows [r_b1, r_b1 + 8)      b1
        pad(w_heads, LANES),   # rows [r_wh, r_wh + 128)    W_heads -> (128, 128)
        pad(b_heads, 8),       # rows [r_bh, r_bh + 8)      b_heads
    ], axis=0)

    return {
        "hidden_units": hidden_units,
        "num_actions": num_actions,
        "s_pad": s_pad, "r_b1": r_b1, "r_wh": r_wh, "r_bh": r_bh,
        "w1": w1, "b1": b1, "w2": w2, "b2": b2, "w3": w3, "b3": b3,
        "packed": packed,
    }


def ac_model_reference(x, params):
    h = jax.nn.relu(x @ params["w1"] + params["b1"])
    probs = jax.nn.softmax(h @ params["w2"] + params["b2"], axis=-1)
    values = h @ params["w3"] + params["b3"]
    return probs, values


if __name__ == "__main__":
    # Small Taxi-like architecture: one-hot states -> hidden -> (action probs, value).
    architecture = {"state_dim": 16, "hidden_units": 32, "num_actions": 8}
    S, H, A = architecture["state_dim"], architecture["hidden_units"], architecture["num_actions"]
    B = 8   # batch several select_action states per call to amortize launch overhead

    key = jax.random.PRNGKey(0)
    k_param, k_x = jax.random.split(key)
    params = init_params(k_param, S, H, A)

    state_ids = jax.random.randint(k_x, (B,), 0, S, dtype=jnp.int32)
    x = jax.nn.one_hot(state_ids, S, dtype=jnp.float32)

    # dense (general forward) path
    probs_d, values_d = ac_model_forward(x, params)
    # one-hot fast path (what select_action feeds forward)
    probs_g, values_g = ac_model_forward_onehot(state_ids, params)
    jax.block_until_ready((probs_d, values_d, probs_g, values_g))

    ref_probs, ref_values = ac_model_reference(x, params)

    assert probs_d.shape == (B, A) and values_d.shape == (B, 1)
    assert probs_g.shape == (B, A) and values_g.shape == (B, 1)
    assert jnp.allclose(probs_d, ref_probs, atol=1e-4, rtol=1e-3)
    assert jnp.allclose(probs_g, ref_probs, atol=1e-4, rtol=1e-3)
    assert jnp.allclose(values_d, ref_values, atol=1e-4, rtol=1e-4)
    assert jnp.allclose(values_g, ref_values, atol=1e-4, rtol=1e-4)
    # exact softmax division -> rows sum to 1 to f32 precision
    assert jnp.allclose(jnp.sum(probs_d, axis=-1), 1.0, atol=1e-3)
    assert jnp.allclose(jnp.sum(probs_g, axis=-1), 1.0, atol=1e-3)

    print("KERNEL_OK")
</pallas_src>

<mosaic_0001>
module attributes {stable_mosaic.version = 11 : i64} {
  func.func @kernel(%arg0: memref<8x16xf32, #tpu.memory_space<vmem>>, %arg1: memref<160x128xf32, #tpu.memory_space<vmem>>, %arg2: memref<8x128xf32, #tpu.memory_space<vmem>>) attributes {dimension_semantics = [], scalar_prefetch = 0 : i64, scratch_operands = 0 : i64, tpu.core_type = #tpu.core_type<tc>} {
    %c0 = arith.constant 0 : index
    %c0_0 = arith.constant 0 : index
    %0 = vector.load %arg0[%c0, %c0_0] : memref<8x16xf32, #tpu.memory_space<vmem>>, vector<8x16xf32>
    %c0_1 = arith.constant 0 : index
    %c0_2 = arith.constant 0 : index
    %1 = vector.load %arg1[%c0_1, %c0_2] : memref<160x128xf32, #tpu.memory_space<vmem>>, vector<16x128xf32>
    %c16 = arith.constant 16 : index
    %c0_3 = arith.constant 0 : index
    %2 = vector.load %arg1[%c16, %c0_3] : memref<160x128xf32, #tpu.memory_space<vmem>>, vector<1x128xf32>
    %c24 = arith.constant 24 : index
    %c0_4 = arith.constant 0 : index
    %3 = vector.load %arg1[%c24, %c0_4] : memref<160x128xf32, #tpu.memory_space<vmem>>, vector<128x128xf32>
    %c152 = arith.constant 152 : index
    %c0_5 = arith.constant 0 : index
    %4 = vector.load %arg1[%c152, %c0_5] : memref<160x128xf32, #tpu.memory_space<vmem>>, vector<1x128xf32>
    %cst = arith.constant dense<0.000000e+00> : vector<8x128xf32>
    %5 = tpu.matmul %0, %1, %cst {dimension_numbers = #tpu.dot_dimension_numbers<[1], [0], [0], [1], [0, 0, 1, 1], [], []>} : vector<8x16xf32>, vector<16x128xf32>, vector<8x128xf32> -> vector<8x128xf32>
    %6 = vector.broadcast %2 : vector<1x128xf32> to vector<8x128xf32>
    %7 = arith.addf %5, %6 : vector<8x128xf32>
    %cst_6 = arith.constant 0.000000e+00 : f32
    %8 = vector.broadcast %cst_6 : f32 to vector<8x128xf32>
    %9 = arith.maximumf %7, %8 : vector<8x128xf32>
    %cst_7 = arith.constant dense<0.000000e+00> : vector<8x128xf32>
    %10 = tpu.matmul %9, %3, %cst_7 {dimension_numbers = #tpu.dot_dimension_numbers<[1], [0], [0], [1], [0, 0, 1, 1], [], []>} : vector<8x128xf32>, vector<128x128xf32>, vector<8x128xf32> -> vector<8x128xf32>
    %11 = vector.broadcast %4 : vector<1x128xf32> to vector<8x128xf32>
    %12 = arith.addf %10, %11 : vector<8x128xf32>
    %13 = tpu.iota {dimensions = array<i32: 1>} : vector<8x128xi32>
    %c8_i32 = arith.constant 8 : i32
    %14 = vector.broadcast %c8_i32 : i32 to vector<8x128xi32>
    %15 = arith.cmpi slt, %13, %14 : vector<8x128xi32>
    %cst_8 = arith.constant 0xFF800000 : f32
    %16 = vector.broadcast %cst_8 : f32 to vector<8x128xf32>
    %17 = arith.select %15, %12, %16 : vector<8x128xi1>, vector<8x128xf32>
    %cst_9 = arith.constant dense<0xFF800000> : vector<8xf32>
    %18 = vector.multi_reduction <maximumf>, %17, %cst_9 [1] : vector<8x128xf32> to vector<8xf32>
    %19 = vector.shape_cast %18 : vector<8xf32> to vector<8x1xf32>
    %20 = vector.broadcast %19 : vector<8x1xf32> to vector<8x128xf32>
    %21 = arith.subf %17, %20 : vector<8x128xf32>
    %22 = math.exp %21 : vector<8x128xf32>
    %cst_10 = arith.constant 0.000000e+00 : f32
    %23 = vector.broadcast %cst_10 : f32 to vector<8x128xf32>
    %24 = arith.select %15, %22, %23 : vector<8x128xi1>, vector<8x128xf32>
    %cst_11 = arith.constant dense<0.000000e+00> : vector<8xf32>
    %25 = vector.multi_reduction <add>, %24, %cst_11 [1] : vector<8x128xf32> to vector<8xf32>
    %26 = vector.shape_cast %25 : vector<8xf32> to vector<8x1xf32>
    %27 = vector.broadcast %26 : vector<8x1xf32> to vector<8x128xf32>
    %28 = arith.divf %24, %27 : vector<8x128xf32>
    %29 = arith.select %15, %28, %12 : vector<8x128xi1>, vector<8x128xf32>
    %c0_12 = arith.constant 0 : index
    %c0_13 = arith.constant 0 : index
    %30 = vector.load %arg2[%c0_12, %c0_13] : memref<8x128xf32, #tpu.memory_space<vmem>>, vector<8x128xf32>
    tpu.vector_store %arg2[%c0_12, %c0_13], %29 {strides = array<i32>} : memref<8x128xf32, #tpu.memory_space<vmem>>, vector<8x128xf32>,
    return
  }
}

</mosaic_0001>

<bundles_post_ra>
// kernel: tpu_custom_call.1
= control target key start
LH: loop header
LB: loop body
LE: loop exit
PB: predicated region body
PF: predicated region fallthrough
CT: control target
= control target key end

     0   :  { %7 = vsyncpa [#allocation3], 0  ;;  %s420_s0 = inlined_call_operand.hbm [shape: f32[8,16], index: 0, kind: input, shape index: {}]   ;;  %s421_s1 = inlined_call_operand.hbm [shape: f32[160,128], index: 1, kind: input, shape index: {}]   ;;  %s422_s2 = inlined_call_operand.hbm [shape: f32[8,128], index: 2, kind: output, shape index: {}]  }
   0x1   :  { %8 = vsyncpa [#allocation6], 0 }
   0x2   :  { %9 = vsyncpa [#allocation4], 0  ;;  %s386_s9 = smov [#allocation2]   ;;  %s387_s11 = smov [#allocation5]  }
   0x3   :  { %s16_s10 = sshll.u32 %s386_s9, 4  ;;  %s25_s12 = sshll.u32 %s387_s11, 4  ;;  %s17_s10 = int_to_ptr.vmem [resolvable:$true] %s16_s10  ;;  %s26_s12 = int_to_ptr.vmem [resolvable:$true] %s25_s12 }
   0x4   :  { %s328_s13 = scalar_lea.vmem %s17_s10, 128  ;;  %p333_p1 = scmp.lt.s32.totalorder %s17_s10, %s17_s10 }
   0x5   :  { %p329_p0 = scmp.ne.s32.totalorder %s17_s10, %s328_s13  ;;  %p334_p2 = scmp.lt.s32.totalorder %s328_s13, %s328_s13 }
   0x7   :  { %p335_p3 = por %p334_p2, %p333_p1 }
   0x9   :  { %p336_p4 = pnand %p335_p3, %p329_p0 }
   0xb   :  { %339 = shalt.err (!%p336_p4)
}
   0xc   :  { %19 = dma.hbm_to_vmem [thread:$0]  %s420_s0, 128, %s17_s10, [#allocation3]  }
   0xd   :  { %s348_s16 = scalar_lea.vmem %s26_s12, 2560  ;;  %p353_p6 = scmp.lt.s32.totalorder %s26_s12, %s26_s12 }
   0xe   :  { %p349_p5 = scmp.ne.s32.totalorder %s26_s12, %s348_s16  ;;  %p354_p7 = scmp.lt.s32.totalorder %s348_s16, %s348_s16 }
  0x10   :  { %p355_p8 = por %p354_p7, %p353_p6 }
  0x12   :  { %p356_p9 = pnand %p355_p8, %p349_p5 }
  0x14   :  { %359 = shalt.err (!%p356_p9)
}
  0x15   :  { %s388_s17 = smov 128   ;;  %s389_s18 = smov 8  }
  0x16   :  { %31 = dma.hbm_to_vmem [thread:$0]  %s421_s1, 2560, %s26_s12, [#allocation6], %s388_s17, %s388_s17, %s389_s18  }
  0x17   :  { %380 = dma.done.wait [#allocation3], 128  }
  0x18   :  { %381 = vsyncadd [#allocation3], 4294967168 }
  0x19   :  { %382 = dma.done.wait [#allocation6], 2560  }
  0x1a   :  { %383 = vsyncadd [#allocation6], 4294964736  ;;  %v390_v0 = vmov 0.0   ;;  %vm391_vm0 = vmmov 0   ;;  %v40_v1 = vld [vmem:[#allocation5 + $0x8] sm:$0xff]  ;;  %v39_v2 = vld [vmem:[#allocation5] sm:$0xff]  ;;  %v212_v25 = vlaneseq }
  0x1b   :  { %267 = vmatprep.subr.mxu0 %v390_v0  ;;  %271 = vmatprep.mubr.msk.f32.mxu0 %vm391_vm0, %v390_v0  ;;  %v38_v3 = vld [vmem:[#allocation2] sm:$0xff]  ;;  %vm63_vm1 = vcmask 130048   ;;  %v57_v4 = vld [vmem:[#allocation5 + $0x90] sm:$0xff]  ;;  %v56_v5 = vld [vmem:[#allocation5 + $0x88] sm:$0xff]  ;;  %s392_s0 = smov [#allocation7]  }
  0x1c   :  { %274 = vmatprep.subr.mxu1 %v390_v0  ;;  %306 = vmatprep.mubr.msk.f32.mxu1 %vm391_vm0, %v390_v0  ;;  %v55_v6 = vld [vmem:[#allocation5 + $0x80] sm:$0xff]  ;;  %v54_v7 = vld [vmem:[#allocation5 + $0x78] sm:$0xff]  ;;  %v53_v8 = vld [vmem:[#allocation5 + $0x70] sm:$0xff]  ;;  %v213_v26 = vand.u32 127, %v212_v25  ;;  %s234_s1 = sshll.u32 %s392_s0, 4  ;;  %s235_s1 = int_to_ptr.vmem [resolvable:$true] %s234_s1 }
  0x1d   :  { %268 = vmatpush3.msra.mxu0 %v40_v1  ;;  %275 = vmatpush3.msra.mxu1 %v57_v4  ;;  %v52_v9 = vld [vmem:[#allocation5 + $0x68] sm:$0xff]  ;;  %v51_v10 = vld [vmem:[#allocation5 + $0x60] sm:$0xff]  ;;  %v50_v11 = vld [vmem:[#allocation5 + $0x58] sm:$0xff]  ;;  %s360_s21 = scalar_lea.vmem %s235_s1, 128  ;;  %p365_p11 = scmp.lt.s32.totalorder %s235_s1, %s235_s1 }
  0x1e   :  { %269 = vmatprep.subr.mxu0 %v390_v0  ;;  %276 = vmatprep.subr.mxu1 %v390_v0  ;;  %v49_v12 = vld [vmem:[#allocation5 + $0x50] sm:$0xff]  ;;  %v48_v13 = vld [vmem:[#allocation5 + $0x48] sm:$0xff]  ;;  %v47_v14 = vld [vmem:[#allocation5 + $0x40] sm:$0xff]  ;;  %vm214_vm2 = vcmp.lt.s32.totalorder %v213_v26, 8  ;;  %p361_p10 = scmp.ne.s32.totalorder %s235_s1, %s360_s21  ;;  %p366_p12 = scmp.lt.s32.totalorder %s360_s21, %s360_s21 }
  0x1f   :  { %270 = vmatpush3.msra.mxu0 %v39_v2  ;;  %277 = vmatpush3.msra.mxu1 %v56_v5  ;;  %v46_v15 = vld [vmem:[#allocation5 + $0x38] sm:$0xff]  ;;  %v45_v16 = vld [vmem:[#allocation5 + $0x30] sm:$0xff]  ;;  %v44_v17 = vld [vmem:[#allocation5 + $0x28] sm:$0xff] }
  0x20   :  { %272 = vmatmul.mubr.msk.f32.vlgmr.msra.gmra.mxu0 %vm63_vm1, %v38_v3  ;;  %278 = vmatprep.subr.mxu1 %v390_v0  ;;  %v43_v18 = vld [vmem:[#allocation5 + $0x20] sm:$0xff]  ;;  %v42_v19 = vld [vmem:[#allocation5 + $0x18] sm:$0xff]  ;;  %v244_v20 = vld [vmem:[#allocation5 + $0x10] ss:$0 sm:$0xff]  ;;  %p367_p13 = por %p366_p12, %p365_p11 }
  0x21   :  { %279 = vmatpush3.msra.mxu1 %v55_v6  ;;  %v246_v27 = vld [vmem:[#allocation5 + $0x98] ss:$0 sm:$0xff] }
  0x22   :  { %280 = vmatprep.subr.mxu1 %v390_v0  ;;  %p368_p0 = pnand %p367_p13, %p361_p10 }
  0x23   :  { %281 = vmatpush3.msra.mxu1 %v54_v7 }
  0x24   :  { %282 = vmatprep.subr.mxu1 %v390_v0 }
  0x25   :  { %283 = vmatpush3.msra.mxu1 %v53_v8 }
  0x26   :  { %284 = vmatprep.subr.mxu1 %v390_v0 }
  0x27   :  { %285 = vmatpush3.msra.mxu1 %v52_v9 }
  0x28   :  { %286 = vmatprep.subr.mxu1 %v390_v0 }
  0x29   :  { %287 = vmatpush3.msra.mxu1 %v51_v10 }
  0x2a   :  { %288 = vmatprep.subr.mxu1 %v390_v0 }
  0x2b   :  { %289 = vmatpush3.msra.mxu1 %v50_v11 }
  0x2c   :  { %290 = vmatprep.subr.mxu1 %v390_v0 }
  0x2d   :  { %291 = vmatpush3.msra.mxu1 %v49_v12 }
  0x2e   :  { %292 = vmatprep.subr.mxu1 %v390_v0 }
  0x2f   :  { %293 = vmatpush3.msra.mxu1 %v48_v13 }
  0x30   :  { %294 = vmatprep.subr.mxu1 %v390_v0 }
  0x31   :  { %295 = vmatpush3.msra.mxu1 %v47_v14 }
  0x32   :  { %296 = vmatprep.subr.mxu1 %v390_v0 }
  0x33   :  { %297 = vmatpush3.msra.mxu1 %v46_v15 }
  0x34   :  { %298 = vmatprep.subr.mxu1 %v390_v0 }
  0x35   :  { %299 = vmatpush3.msra.mxu1 %v45_v16 }
  0x36   :  { %300 = vmatprep.subr.mxu1 %v390_v0 }
  0x37   :  { %301 = vmatpush3.msra.mxu1 %v44_v17 }
  0x38   :  { %302 = vmatprep.subr.mxu1 %v390_v0 }
  0x39   :  { %303 = vmatpush3.msra.mxu1 %v43_v18 }
  0x3a   :  { %304 = vmatprep.subr.mxu1 %v390_v0 }
  0x3b   :  { %305 = vmatpush3.msra.mxu1 %v42_v19 }
  0xe0   :  { %v133_v21 = vpop.f32.mrf.mxu0 }
  0xe1   :  { %v134_v22 = vadd.f32 %v244_v20, %v133_v21 }
  0xe2   :  { %v273_v23 = vpop.f32.mrf.mxu0 }
  0xe3   :  { %v137_v24 = vmax.f32 %v134_v22, 0.0 }
  0xe5   :  { %307 = vmatmul.mubr.f32.vlgmr.msra.gmra.mxu1 %v137_v24 }
 0x1a5   :  { %v208_v28 = vpop.f32.mrf.mxu1 }
 0x1a6   :  { %v209_v29 = vadd.f32 %v246_v27, %v208_v28 }
 0x1a7   :  { %v308_v30 = vpop.f32.mrf.mxu1 }
 0x1a8   :  { %v215_v31 = vsel %vm214_vm2, %v209_v29, -inf }
 0x1a9   :  { %216 = vmax.xlane.f32.xlu0 %v215_v31 }
 0x232   :  { %v217_v32 = vpop.xlane.xlu0 %216 }
 0x233   :  { %v218_v33 = vsub.f32 %v215_v31, %v217_v32 }
 0x235   :  { %v219_v34 = vmul.f32 1.442695, %v218_v33 }
 0x237   :  { %316 = vpow2.f32 %v219_v34 }
 0x244   :  { %v317_v35 = vpop.eup %316 }
 0x245   :  { %v221_v36 = vsel %vm214_vm2, %v317_v35, 0.0 }
 0x246   :  { %222 = vadd.xlane.f32.xlu0 %v221_v36 }
 0x2cf   :  { %v223_v37 = vpop.xlane.xlu0 %222 }
 0x2d0   :  { %318 = vrcp.f32 %v223_v37 }
 0x2dd   :  { %v319_v38 = vpop.eup %318 }
 0x2de   :  { %v225_v39 = vmul.f32 %v319_v38, %v221_v36 }
 0x2e0   :  { %v226_v40 = vsel %vm214_vm2, %v225_v39, %v209_v29 }
 0x2e1   :  { %227 = vst [vmem:[#allocation7] sm:$0xff] %v226_v40 }
 0x2e2   :  { %371 = shalt.err (!%p368_p0)
}
 0x2e3   :  { %237 = dma.vmem_to_hbm [thread:$0]  %s235_s1, 128, %s422_s2, [#allocation4]  }
 0x2e4   :  { %384 = dma.done.wait [#allocation4], 128  }
 0x2e5   :  { %385 = vsyncadd [#allocation4], 4294967168 }
 0x2e6   :  { %241 = vsyncpa [#allocation3], 1 }
 0x2e7   :  { %242 = vsyncpa [#allocation6], 1 }
 0x2e8   :  { %243 = vsyncpa [#allocation4], 1 }

</bundles_post_ra>
